<compile_context>
chip_gen: v6e
topology: v6e:2x2x1
jax: 0.10.0
libtpu: 0.0.40
codegen_flags: <defaults>
</compile_context>

<pallas_src>
import jax
import jax.numpy as jnp
from jax.experimental import pallas as pl
from jax.experimental.pallas import tpu as pltpu


def _round_up(n, m):
    return ((n + m - 1) // m) * m


def _choose_tb(B, block_b):
    """Batch tile: multiple of 8 (f32 sublanes), preferring 16 (bf16 packing),
    capped at block_b; large batches keep >= 2 grid steps so the 'parallel'
    batch axis can shard across both v7x TensorCores."""
    B8 = _round_up(max(B, 1), 8)
    tb = min(block_b, B8)
    if B8 >= 32 and pl.cdiv(B8, tb) < 2:
        tb = max(16, _round_up(pl.cdiv(B8, 2), 16))
    return max(8, tb)


def _mlp_kernel(x_ref, w1_ref, b1_ref, w2_ref, b2_ref, w3r_ref, b3_ref, o_ref):
    # Cast the x tile to bf16 here (x streams from HBM as f32 exactly once; no
    # separate wrapper-side cast pass over the whole array).
    x = x_ref[...].astype(jnp.bfloat16)

    # layer_1: bf16 MXU operands, f32 accumulate; bias + ReLU in f32 on the VPU.
    h = jnp.dot(x, w1_ref[...], preferred_element_type=jnp.float32)
    h = jnp.maximum(h + b1_ref[...], 0.0)

    # layer_2 (BN1 folded into w2/b2 offline).
    h = jnp.dot(h.astype(jnp.bfloat16), w2_ref[...],
                preferred_element_type=jnp.float32)
    h = jnp.maximum(h + b2_ref[...], 0.0)

    # dropout (eval mode) -> identity; BN2 folded into w3/b3 offline.
    # layer_out: [TB,H]@[H,1] done as a VPU multiply + cross-lane reduction
    # (avoids a wasted N=1 MXU pass).  b3 is an SMEM scalar.
    r = jnp.sum(h * w3r_ref[...], axis=-1, keepdims=True) + b3_ref[0, 0]

    # Lane-dense store: one [1, TB] row per grid step (the (TB,1)->(1,TB)
    # transpose goes through the otherwise-idle XLU).
    o_ref[...] = r.T[None]


def fold_params(p):
    """One-time prep: fold BN affines into the next linear layer, pre-cast the
    MXU weight operands to bf16, keep biases / VPU operands in f32."""
    w2f = p["bn1_scale"].reshape(-1, 1) * p["w2"]          # [H, H]
    b2f = p["bn1_shift"] @ p["w2"] + p["b2"]               # [1, H]
    w3f = p["bn2_scale"].reshape(-1, 1) * p["w3"]          # [H, 1]
    b3f = p["bn2_shift"] @ p["w3"] + p["b3"]               # [1, 1]
    return {
        "w1": p["w1"].astype(jnp.bfloat16),
        "b1": p["b1"].astype(jnp.float32),
        "w2": w2f.astype(jnp.bfloat16),
        "b2": b2f.astype(jnp.float32),
        "w3_row": w3f.T.astype(jnp.float32),               # [1, H], VPU operand
        "b3": b3f.astype(jnp.float32),                      # [1, 1], SMEM scalar
    }


def binary_classification_forward(x, fp, *, block_b=4096):
    """x: [B, D] float32 (streamed as f32; cast to bf16 inside the kernel).
    fp: output of fold_params. Returns [B, 1] float32."""
    B, D = x.shape
    H = fp["w1"].shape[1]

    TB = _choose_tb(B, block_b)
    grid_n = pl.cdiv(B, TB)   # no jnp.pad of x: a trailing partial block reads
                              # garbage rows that the final [:B] slice drops.

    def const(shape):
        # Constant index_map -> block stays VMEM-resident across grid steps.
        return pl.BlockSpec(shape, lambda i: (0,) * len(shape))

    in_specs = [
        pl.BlockSpec((TB, D), lambda i: (i, 0)),            # x: batch-tiled, f32
        const(fp["w1"].shape), const(fp["b1"].shape),        # VMEM-resident params
        const(fp["w2"].shape), const(fp["b2"].shape),
        const(fp["w3_row"].shape),
        pl.BlockSpec(memory_space=pltpu.MemorySpace.SMEM),    # b3: SMEM scalar
    ]
    # Lane-dense output: one [1, TB] f32 row per grid step.
    out_specs = pl.BlockSpec((1, 1, TB), lambda i: (i, 0, 0))

    flops = 2 * grid_n * TB * (D * H + H * H + H)
    bytes_accessed = (
        B * D * 4 + grid_n * TB * 4                          # x (f32) + out (f32)
        + fp["w1"].size * 2 + fp["w2"].size * 2              # bf16 weights
        + (fp["b1"].size + fp["b2"].size
           + fp["w3_row"].size + fp["b3"].size) * 4          # f32 biases / w3 row
    )

    out = pl.pallas_call(
        _mlp_kernel,
        out_shape=jax.ShapeDtypeStruct((grid_n, 1, TB), jnp.float32),
        grid=(grid_n,),
        in_specs=in_specs,
        out_specs=out_specs,
        compiler_params=pltpu.CompilerParams(
            dimension_semantics=("parallel",)),
        cost_estimate=pl.CostEstimate(
            flops=flops, transcendentals=0, bytes_accessed=bytes_accessed),
    )(x, fp["w1"], fp["b1"], fp["w2"], fp["b2"], fp["w3_row"], fp["b3"])

    # Contiguous reshape back to column form; slice drops padded/garbage rows.
    return out.reshape(grid_n * TB, 1)[:B]


def init_params(key, input_dim, hidden=64):
    """Deterministic init matching the PyTorch module's parameter shapes.
    Linear weights are stored transposed ([in, out]); BN running stats are the
    PyTorch defaults, gamma/beta perturbed so the affine path is exercised."""
    ks = jax.random.split(key, 10)
    eps = 1e-5

    def linear(kw, kb, fan_in, fan_out):
        bound = 1.0 / jnp.sqrt(fan_in)
        w = jax.random.uniform(kw, (fan_in, fan_out), jnp.float32, -bound, bound)
        b = jax.random.uniform(kb, (1, fan_out), jnp.float32, -bound, bound)
        return w, b

    w1, b1 = linear(ks[0], ks[1], input_dim, hidden)
    w2, b2 = linear(ks[2], ks[3], hidden, hidden)
    w3, b3 = linear(ks[4], ks[5], hidden, 1)

    g1 = 1.0 + 0.1 * jax.random.normal(ks[6], (1, hidden), jnp.float32)
    be1 = 0.1 * jax.random.normal(ks[7], (1, hidden), jnp.float32)
    g2 = 1.0 + 0.1 * jax.random.normal(ks[8], (1, hidden), jnp.float32)
    be2 = 0.1 * jax.random.normal(ks[9], (1, hidden), jnp.float32)
    rm = jnp.zeros((1, hidden), jnp.float32)
    rv = jnp.ones((1, hidden), jnp.float32)

    s1 = g1 / jnp.sqrt(rv + eps)
    t1 = be1 - rm * s1
    s2 = g2 / jnp.sqrt(rv + eps)
    t2 = be2 - rm * s2

    return {
        "w1": w1, "b1": b1, "bn1_scale": s1, "bn1_shift": t1,
        "w2": w2, "b2": b2, "bn2_scale": s2, "bn2_shift": t2,
        "w3": w3, "b3": b3,
    }


def reference_forward(x, p):
    """Pure-f32 JAX reference of the eval-mode PyTorch forward
    (Linear -> ReLU -> BN -> Linear -> ReLU -> BN -> Dropout(eval) -> Linear)."""
    h = jnp.maximum(x @ p["w1"] + p["b1"], 0.0) * p["bn1_scale"] + p["bn1_shift"]
    h = jnp.maximum(h @ p["w2"] + p["b2"], 0.0) * p["bn2_scale"] + p["bn2_shift"]
    return h @ p["w3"] + p["b3"]


if __name__ == "__main__":
    key = jax.random.PRNGKey(0)
    k_x, k_p = jax.random.split(key)

    D = 32  # input_shape
    params = init_params(k_p, D)
    folded = fold_params(params)

    # B=8: single grid step.  B=64: two grid steps (exercises the batch-tiled,
    # megacore-shardable path and the lane-dense output reassembly).
    for B in (8, 64):
        xb = jax.random.normal(jax.random.fold_in(k_x, B), (B, D), jnp.float32)
        out = jax.block_until_ready(binary_classification_forward(xb, folded))
        ref = reference_forward(xb, params)
        assert out.shape == (B, 1)
        # bf16 MXU operands (f32 accumulation) -> loosened tolerance vs f32 ref.
        assert jnp.allclose(out, ref, atol=3e-2, rtol=3e-2), \
            f"mismatch vs pure-JAX reference at B={B}"

    print("KERNEL_OK")
</pallas_src>

<mosaic_0001>
module attributes {stable_mosaic.version = 11 : i64} {
  func.func @_mlp_kernel(%arg0: i32, %arg1: memref<8x32xf32, #tpu.memory_space<vmem>>, %arg2: memref<32x64xbf16, #tpu.memory_space<vmem>>, %arg3: memref<1x64xf32, #tpu.memory_space<vmem>>, %arg4: memref<64x64xbf16, #tpu.memory_space<vmem>>, %arg5: memref<1x64xf32, #tpu.memory_space<vmem>>, %arg6: memref<1x64xf32, #tpu.memory_space<vmem>>, %arg7: memref<1x1xf32, #tpu.memory_space<smem>>, %arg8: memref<1x1x8xf32, #tpu.memory_space<vmem>>) attributes {dimension_semantics = [#tpu.dimension_semantics<parallel>], iteration_bounds = array<i64: 1>, scalar_prefetch = 0 : i64, scratch_operands = 0 : i64, tpu.core_type = #tpu.core_type<tc>, window_params = [{transform_indices = @transform_0, window_bounds = array<i64: 8, 32>}, {pipeline_mode = #tpu.pipeline_mode<synchronous>, transform_indices = @transform_1, window_bounds = array<i64: 32, 64>}, {pipeline_mode = #tpu.pipeline_mode<synchronous>, transform_indices = @transform_2, window_bounds = array<i64: 1, 64>}, {pipeline_mode = #tpu.pipeline_mode<synchronous>, transform_indices = @transform_3, window_bounds = array<i64: 64, 64>}, {pipeline_mode = #tpu.pipeline_mode<synchronous>, transform_indices = @transform_4, window_bounds = array<i64: 1, 64>}, {pipeline_mode = #tpu.pipeline_mode<synchronous>, transform_indices = @transform_5, window_bounds = array<i64: 1, 64>}, {transform_indices = @transform_6, window_bounds = array<i64: 1, 1>}, {transform_indices = @transform_7, window_bounds = array<i64: 1, 1, 8>}]} {
    %c0 = arith.constant 0 : index
    %c0_0 = arith.constant 0 : index
    %0 = vector.load %arg1[%c0, %c0_0] : memref<8x32xf32, #tpu.memory_space<vmem>>, vector<8x32xf32>
    %1 = arith.truncf %0 : vector<8x32xf32> to vector<8x32xbf16>
    %c0_1 = arith.constant 0 : index
    %c0_2 = arith.constant 0 : index
    %2 = vector.load %arg2[%c0_1, %c0_2] : memref<32x64xbf16, #tpu.memory_space<vmem>>, vector<32x64xbf16>
    %cst = arith.constant dense<0.000000e+00> : vector<8x64xf32>
    %3 = tpu.matmul %1, %2, %cst {dimension_numbers = #tpu.dot_dimension_numbers<[1], [0], [0], [1], [0, 0, 1, 1], [], []>} : vector<8x32xbf16>, vector<32x64xbf16>, vector<8x64xf32> -> vector<8x64xf32>
    %c0_3 = arith.constant 0 : index
    %c0_4 = arith.constant 0 : index
    %4 = vector.load %arg3[%c0_3, %c0_4] : memref<1x64xf32, #tpu.memory_space<vmem>>, vector<1x64xf32>
    %5 = vector.broadcast %4 : vector<1x64xf32> to vector<8x64xf32>
    %6 = arith.addf %3, %5 : vector<8x64xf32>
    %cst_5 = arith.constant 0.000000e+00 : f32
    %7 = vector.broadcast %cst_5 : f32 to vector<8x64xf32>
    %8 = arith.maximumf %6, %7 : vector<8x64xf32>
    %9 = arith.truncf %8 : vector<8x64xf32> to vector<8x64xbf16>
    %c0_6 = arith.constant 0 : index
    %c0_7 = arith.constant 0 : index
    %10 = vector.load %arg4[%c0_6, %c0_7] : memref<64x64xbf16, #tpu.memory_space<vmem>>, vector<64x64xbf16>
    %cst_8 = arith.constant dense<0.000000e+00> : vector<8x64xf32>
    %11 = tpu.matmul %9, %10, %cst_8 {dimension_numbers = #tpu.dot_dimension_numbers<[1], [0], [0], [1], [0, 0, 1, 1], [], []>} : vector<8x64xbf16>, vector<64x64xbf16>, vector<8x64xf32> -> vector<8x64xf32>
    %c0_9 = arith.constant 0 : index
    %c0_10 = arith.constant 0 : index
    %12 = vector.load %arg5[%c0_9, %c0_10] : memref<1x64xf32, #tpu.memory_space<vmem>>, vector<1x64xf32>
    %13 = vector.broadcast %12 : vector<1x64xf32> to vector<8x64xf32>
    %14 = arith.addf %11, %13 : vector<8x64xf32>
    %cst_11 = arith.constant 0.000000e+00 : f32
    %15 = vector.broadcast %cst_11 : f32 to vector<8x64xf32>
    %16 = arith.maximumf %14, %15 : vector<8x64xf32>
    %c0_12 = arith.constant 0 : index
    %c0_13 = arith.constant 0 : index
    %17 = vector.load %arg6[%c0_12, %c0_13] : memref<1x64xf32, #tpu.memory_space<vmem>>, vector<1x64xf32>
    %18 = vector.broadcast %17 : vector<1x64xf32> to vector<8x64xf32>
    %19 = arith.mulf %16, %18 : vector<8x64xf32>
    %cst_14 = arith.constant dense<0.000000e+00> : vector<8xf32>
    %20 = vector.multi_reduction <add>, %19, %cst_14 [1] : vector<8x64xf32> to vector<8xf32>
    %21 = vector.shape_cast %20 : vector<8xf32> to vector<8x1xf32>
    %c0_15 = arith.constant 0 : index
    %c0_16 = arith.constant 0 : index
    %22 = memref.load %arg7[%c0_15, %c0_16] : memref<1x1xf32, #tpu.memory_space<smem>>
    %23 = vector.broadcast %22 : f32 to vector<8x1xf32>
    %24 = arith.addf %21, %23 : vector<8x1xf32>
    %25 = tpu.transpose %24, [1, 0] : vector<8x1xf32> -> vector<1x8xf32>
    %26 = vector.shape_cast %25 : vector<1x8xf32> to vector<1x1x8xf32>
    %c0_17 = arith.constant 0 : index
    %c0_18 = arith.constant 0 : index
    %c0_19 = arith.constant 0 : index
    %27 = vector.load %arg8[%c0_17, %c0_18, %c0_19] : memref<1x1x8xf32, #tpu.memory_space<vmem>>, vector<1x1x8xf32>
    tpu.vector_store %arg8[%c0_17, %c0_18, %c0_19], %26 {strides = array<i32>} : memref<1x1x8xf32, #tpu.memory_space<vmem>>, vector<1x1x8xf32>,
    return
  }
  func.func @transform_0(%arg0: i32) -> (i32, i32) {
    %c0_i32 = arith.constant 0 : i32
    %c0_i32_0 = arith.constant 0 : i32
    return %arg0, %c0_i32 : i32, i32
  }
  func.func @transform_1(%arg0: i32) -> (i32, i32) {
    %c0_i32 = arith.constant 0 : i32
    %c0_i32_0 = arith.constant 0 : i32
    %c0_i32_1 = arith.constant 0 : i32
    return %c0_i32, %c0_i32_0 : i32, i32
  }
  func.func @transform_2(%arg0: i32) -> (i32, i32) {
    %c0_i32 = arith.constant 0 : i32
    %c0_i32_0 = arith.constant 0 : i32
    %c0_i32_1 = arith.constant 0 : i32
    return %c0_i32, %c0_i32_0 : i32, i32
  }
  func.func @transform_3(%arg0: i32) -> (i32, i32) {
    %c0_i32 = arith.constant 0 : i32
    %c0_i32_0 = arith.constant 0 : i32
    %c0_i32_1 = arith.constant 0 : i32
    return %c0_i32, %c0_i32_0 : i32, i32
  }
  func.func @transform_4(%arg0: i32) -> (i32, i32) {
    %c0_i32 = arith.constant 0 : i32
    %c0_i32_0 = arith.constant 0 : i32
    %c0_i32_1 = arith.constant 0 : i32
    return %c0_i32, %c0_i32_0 : i32, i32
  }
  func.func @transform_5(%arg0: i32) -> (i32, i32) {
    %c0_i32 = arith.constant 0 : i32
    %c0_i32_0 = arith.constant 0 : i32
    %c0_i32_1 = arith.constant 0 : i32
    return %c0_i32, %c0_i32_0 : i32, i32
  }
  func.func @transform_6(%arg0: i32) -> (i32, i32) {
    %c0_i32 = arith.constant 0 : i32
    %c0_i32_0 = arith.constant 0 : i32
    %c0_i32_1 = arith.constant 0 : i32
    return %c0_i32, %c0_i32_0 : i32, i32
  }
  func.func @transform_7(%arg0: i32) -> (i32, i32, i32) {
    %c0_i32 = arith.constant 0 : i32
    %c0_i32_0 = arith.constant 0 : i32
    %c0_i32_1 = arith.constant 0 : i32
    return %arg0, %c0_i32, %c0_i32_0 : i32, i32, i32
  }
}

</mosaic_0001>

<bundles_post_ra>
// kernel: tpu_custom_call.1
= control target key start
LH: loop header
LB: loop body
LE: loop exit
PB: predicated region body
PF: predicated region fallthrough
CT: control target
= control target key end

     0   :  { %13 = vsyncpa [#allocation4], 0  ;;  %s498_s0 = inlined_call_operand.hbm [shape: f32[8,32], index: 0, kind: input, shape index: {}]   ;;  %s499_s1 = inlined_call_operand.hbm [shape: bf16[32,64], index: 1, kind: input, shape index: {}]   ;;  %s500_s2 = inlined_call_operand.vmem [shape: f32[1,64], index: 2, kind: input, shape index: {}]   ;;  %s501_s3 = inlined_call_operand.hbm [shape: bf16[64,64], index: 3, kind: input, shape index: {}]   ;;  %s502_s4 = inlined_call_operand.vmem [shape: f32[1,64], index: 4, kind: input, shape index: {}]   ;;  %s503_s5 = inlined_call_operand.vmem [shape: f32[1,64], index: 5, kind: input, shape index: {}]   ;;  %s504_s6 = inlined_call_operand.<no memory space> [shape: f32[1,1], index: 6, kind: input, shape index: {}]   ;;  %s505_s7 = inlined_call_operand.hbm [shape: f32[1,1,8], index: 7, kind: output, shape index: {}]  }
   0x1   :  { %14 = vsyncpa [#allocation7], 0 }
   0x2   :  { %15 = vsyncpa [#allocation5], 0  ;;  %s426_s24 = smov [#allocation6]  }
   0x3   :  { %s31_s25 = sshll.u32 %s426_s24, 4  ;;  %s32_s25 = int_to_ptr.vmem [resolvable:$true] %s31_s25 }
   0x4   :  { %s348_s26 = scalar_lea.vmem %s32_s25, 256  ;;  %p353_p1 = scmp.lt.s32.totalorder %s32_s25, %s32_s25 }
   0x5   :  { %p349_p0 = scmp.ne.s32.totalorder %s32_s25, %s348_s26  ;;  %p354_p2 = scmp.lt.s32.totalorder %s348_s26, %s348_s26 }
   0x7   :  { %p355_p3 = por %p354_p2, %p353_p1 }
   0x9   :  { %p356_p4 = pnand %p355_p3, %p349_p0 }
   0xb   :  { %359 = shalt.err (!%p356_p4)
}
   0xc   :  { %s427_s27 = smov 64   ;;  %s428_s28 = smov 4  }
   0xd   :  { %37 = dma.hbm_to_vmem [thread:$0]  %s499_s1, 256, %s32_s25, [#allocation7], %s427_s27, %s427_s27, %s428_s28  }
   0xe   :  { %s429_s8 = smov [#allocation3]   ;;  %s430_s10 = smov [#allocation8]  }
   0xf   :  { %s22_s9 = sshll.u32 %s429_s8, 4  ;;  %s45_s11 = sshll.u32 %s430_s10, 4  ;;  %s23_s9 = int_to_ptr.vmem [resolvable:$true] %s22_s9  ;;  %s46_s11 = int_to_ptr.vmem [resolvable:$true] %s45_s11 }
  0x10   :  { %s368_s12 = scalar_lea.vmem %s23_s9, 128  ;;  %p373_p6 = scmp.lt.s32.totalorder %s23_s9, %s23_s9 }
  0x11   :  { %p369_p5 = scmp.ne.s32.totalorder %s23_s9, %s368_s12  ;;  %p374_p7 = scmp.lt.s32.totalorder %s368_s12, %s368_s12 }
  0x13   :  { %p375_p8 = por %p374_p7, %p373_p6 }
  0x15   :  { %p376_p9 = pnand %p375_p8, %p369_p5 }
  0x17   :  { %379 = shalt.err (!%p376_p9)
}
  0x18   :  { %25 = dma.hbm_to_vmem [thread:$0]  %s498_s0, 128, %s23_s9, [#allocation4]  }
  0x19   :  { %s388_s15 = scalar_lea.vmem %s46_s11, 512  ;;  %p393_p11 = scmp.lt.s32.totalorder %s46_s11, %s46_s11 }
  0x1a   :  { %p389_p10 = scmp.ne.s32.totalorder %s46_s11, %s388_s15  ;;  %p394_p12 = scmp.lt.s32.totalorder %s388_s15, %s388_s15 }
  0x1c   :  { %p395_p13 = por %p394_p12, %p393_p11 }
  0x1e   :  { %p396_p0 = pnand %p395_p13, %p389_p10 }
  0x20   :  { %399 = shalt.err (!%p396_p0)
}
  0x21   :  { %51 = dma.hbm_to_vmem [thread:$0]  %s501_s3, 512, %s46_s11, [#allocation7], %s427_s27, %s427_s27, %s428_s28  }
  0x22   :  { %420 = dma.done.wait [#allocation4], 128  }
  0x23   :  { %421 = vsyncadd [#allocation4], 4294967168 }
  0x24   :  { %422 = dma.done.wait [#allocation7], 768  }
  0x25   :  { %423 = vsyncadd [#allocation7], 4294966528  ;;  %v431_v0 = vmov 0.0   ;;  %vm432_vm0 = vmmov 0   ;;  %v334_v1 = vld [vmem:[#allocation6 + $0x8] sm:$0xff]   ;;  %v335_v2 = vld [vmem:[#allocation6] sm:$0xff]   ;;  %v235_v27 = vstv %s504_s6 }
  0x26   :  { %306 = vmatprep.subr.bf16.mxu0 %v431_v0  ;;  %310 = vmatprep.mubr.msk.bf16.mxu0 %vm432_vm0, %v431_v0  ;;  %v68_v3 = vld [vmem:[#allocation3] sm:$0xff]  ;;  %v336_v4 = vld [vmem:[#allocation8 + $0x18] sm:$0xff]   ;;  %v337_v5 = vld [vmem:[#allocation8 + $0x10] sm:$0xff]   ;;  %vm93_vm1 = vcmask 261120   ;;  %vm178_vm2 = vcmask 523264   ;;  %vm269_vm3 = vcmask 57344  }
  0x27   :  { %314 = vmatprep.subr.bf16.mxu1 %v431_v0  ;;  %322 = vmatprep.mubr.msk.bf16.mxu1 %vm432_vm0, %v431_v0  ;;  %v69_v6 = vpack.c.bf16 %v68_v3, %v68_v3  ;;  %v338_v7 = vld [vmem:[#allocation8 + $0x8] sm:$0xff]   ;;  %v339_v8 = vld [vmem:[#allocation8] sm:$0xff]  }
  0x28   :  { %307 = vmatpush3.bf16.msra.mxu0 %v334_v1  ;;  %315 = vmatpush3.bf16.msra.mxu1 %v336_v4  ;;  %v287_v9 = vld [vmem:[%s500_s2] ss:$0 sm:$0xff] }
  0x29   :  { %308 = vmatprep.subr.bf16.mxu0 %v431_v0  ;;  %316 = vmatprep.subr.bf16.mxu1 %v431_v0  ;;  %v291_v17 = vld [vmem:[%s502_s4] ss:$0 sm:$0xff]  ;;  %s433_s4 = smov [#allocation9]  }
  0x2a   :  { %v297_v21 = vld [vmem:[%s503_s5] ss:$0 sm:$0xff]  ;;  %s277_s22 = sshll.u32 %s433_s4, 4  ;;  %s278_s22 = int_to_ptr.vmem [resolvable:$true] %s277_s22 }
  0x2b   :  { %s400_s5 = scalar_lea.vmem %s278_s22, 16  ;;  %s404_s23 = scalar_lea.vmem %s278_s22, 32 }
  0x2c   :  { %309 = vmatpush3.bf16.msra.mxu0 %v335_v2  ;;  %317 = vmatpush3.bf16.msra.mxu1 %v337_v5  ;;  %p401_p1 = scmp.ne.s32.totalorder %s278_s22, %s400_s5  ;;  %p405_p2 = scmp.lt.s32.totalorder %s278_s22, %s278_s22 }
  0x2d   :  { %318 = vmatprep.subr.bf16.mxu1 %v431_v0  ;;  %p406_p3 = scmp.lt.s32.totalorder %s404_s23, %s400_s5 }
  0x2f   :  { %311 = vmatmul.mubr.msk.bf16.vlgmr.msra.gmra.mxu0 %vm93_vm1, %v69_v6  ;;  %p407_p4 = por %p406_p3, %p405_p2 }
  0x30   :  { %319 = vmatpush3.bf16.msra.mxu1 %v338_v7 }
  0x31   :  { %320 = vmatprep.subr.bf16.mxu1 %v431_v0  ;;  %p408_p5 = pnand %p407_p4, %p401_p1 }
  0x34   :  { %321 = vmatpush3.bf16.msra.mxu1 %v339_v8 }
  0xef   :  { %v131_v10 = vpop.f32.mrf.mxu0 }
  0xf0   :  { %v132_v11 = vadd.f32 %v287_v9, %v131_v10 }
  0xf1   :  { %v312_v12 = vpop.f32.mrf.mxu0 }
  0xf2   :  { %v137_v13 = vmax.f32 %v132_v11, 0.0 }
  0xf3   :  { %v134_v14 = vpop.f32.mrf.mxu0 }
  0xf4   :  { %v138_v15 = vpack.c.bf16 %v137_v13, %v137_v13 }
  0xf5   :  { %v313_v16 = vpop.f32.mrf.mxu0 }
  0xf6   :  { %323 = vmatmul.mubr.msk.bf16.vlgmr.msra.gmra.mxu1 %vm178_vm2, %v138_v15 }
 0x1b6   :  { %v216_v18 = vpop.f32.mrf.mxu1 }
 0x1b7   :  { %v217_v19 = vadd.f32 %v291_v17, %v216_v18 }
 0x1b8   :  { %v324_v20 = vpop.f32.mrf.mxu1 }
 0x1b9   :  { %v222_v22 = vmax.f32 %v217_v19, 0.0 }
 0x1ba   :  { %v219_v23 = vpop.f32.mrf.mxu1 }
 0x1bb   :  { %v230_v24 = vmul.f32 %v297_v21, %v222_v22 }
 0x1bc   :  { %v325_v25 = vpop.f32.mrf.mxu1 }
 0x1bd   :  { %v231_v26 = vsel %vm178_vm2, %v230_v24, 0.0 }
 0x1be   :  { %232 = vadd.xlane.f32.xlu0 %v231_v26 }
 0x247   :  { %v233_v28 = vpop.xlane.xlu0 %232 }
 0x248   :  { %v236_v29 = vadd.f32 %v235_v27, %v233_v28 }
 0x24a   :  { %237 = vxpose.xlu0.b32.start.end [1/1] (short) (narrow) %v236_v29, 8 }
 0x2c6   :  { %v253_v30 = vpop.trf.xlu0 }
 0x2c7   :  { %270 = vst.msk [vmem:[#allocation9] sm:$0x1] %vm269_vm3, %v253_v30 }
 0x2c8   :  { %411 = shalt.err (!%p408_p5)
}
 0x2c9   :  { %280 = dma.vmem_to_hbm [thread:$0]  %s278_s22, 16, %s505_s7, [#allocation5]  }
 0x2ca   :  { %424 = dma.done.wait [#allocation5], 16  }
 0x2cb   :  { %425 = vsyncadd [#allocation5], 4294967280 }
 0x2cc   :  { %284 = vsyncpa [#allocation4], 1 }
 0x2cd   :  { %285 = vsyncpa [#allocation7], 1 }
 0x2ce   :  { %286 = vsyncpa [#allocation5], 1 }

</bundles_post_ra>
